<compile_context>
chip_gen: v7x
topology: tpu7x:2x2x1
jax: 0.10.0
libtpu: 0.0.40
codegen_flags: <defaults>
</compile_context>

<pallas_src>
import jax
import jax.numpy as jnp
from jax.experimental import pallas as pl
from jax.experimental.pallas import tpu as pltpu

_SUBLANE = 8                      # f32 vreg sublane depth
_SMALL_FALLBACK_ELEMS = 1024      # below this, Pallas is pure launch/DMA overhead
_VMEM_BLOCK_BUDGET = 2 * 1024 * 1024   # bytes per block; 4x (dbl-buffered in+out)
                                       # stays far under every chip's scoped VMEM


def _softmax_rows_kernel(x_ref, o_ref):
    """Numerically stable softmax over the last (lane) axis of one row tile.

    Rows in a partial edge block may contain unspecified data; softmax is
    strictly per-row and their writeback is masked by Pallas, so they are safe.
    Do NOT add any cross-row reduction here without re-adding row masking.
    """
    x = x_ref[...]
    if x.dtype != jnp.float32:            # keep f32 compute (v5e: no bf16 VPU/EUP)
        x = x.astype(jnp.float32)
    m = jnp.max(x, axis=-1, keepdims=True)
    e = jnp.exp(x - m)
    s = jnp.sum(e, axis=-1, keepdims=True)
    # EUP reciprocal + VALU multiply; approx=False stays within ~1 ulp of e / s.
    o_ref[...] = (e * pl.reciprocal(s, approx=False)).astype(o_ref.dtype)


def softmax_rows(x: jax.Array, *, row_tile: int = 512,
                 force_pallas: bool = False) -> jax.Array:
    """Row-wise softmax of a (num_rows, operations) array.

    * Tiny inputs fall back to jax.nn.softmax (XLA fuses them for free) unless
      force_pallas=True.
    * No host-side padding: lane dim uses the full array extent, row axis uses
      pl.cdiv grid with Pallas edge-block masking for non-multiple row counts.
    * Output dtype matches input dtype; compute is always f32 in-kernel, so
      bf16 inputs halve HBM traffic without changing numerics materially.
    """
    n, ops = x.shape
    if not force_pallas and n * ops <= _SMALL_FALLBACK_ELEMS:
        # The (1, operations) forward path lands here: a pallas_call would be
        # 100% dispatch + DMA overhead around ~0 compute.
        return jax.nn.softmax(x, axis=-1)

    itemsize = jnp.dtype(x.dtype).itemsize
    # Cap rows-per-block so 4 * block_bytes (double-buffered in + out) stays
    # well inside the default scoped VMEM of v5e (16 MiB) / v6e / v7x (32 MiB).
    max_rows_by_vmem = max(_SUBLANE, _VMEM_BLOCK_BUDGET // max(1, ops * itemsize))
    tile_rows = min(row_tile, max_rows_by_vmem)
    tile_rows = max(_SUBLANE, (tile_rows // _SUBLANE) * _SUBLANE)
    if n <= tile_rows:
        tile_rows = n            # block dim == full array dim: always legal, grid of 1
    grid_rows = pl.cdiv(n, tile_rows)

    # TODO(synk): if `operations` ever grows so large that even an 8-row block
    # exceeds the VMEM budget (tens of MB per row-chunk), add lane-axis tiling
    # (two-pass / online softmax); required earlier on v7x's 64 MiB VMEM.
    return pl.pallas_call(
        _softmax_rows_kernel,
        out_shape=jax.ShapeDtypeStruct((n, ops), x.dtype),
        grid=(grid_rows,),
        in_specs=[pl.BlockSpec((tile_rows, ops), lambda i: (i, 0))],
        out_specs=pl.BlockSpec((tile_rows, ops), lambda i: (i, 0)),
        compiler_params=pltpu.CompilerParams(
            dimension_semantics=("parallel",)),
    )(x)


def weights_forward(weights: jax.Array, *, force_pallas: bool = False) -> jax.Array:
    """Pallas equivalent of Weights.forward(): softmax over the weight vector.

    In a real NAS training step this softmax should be fused into its consumer
    (the weighted sum of candidate-op outputs); standalone, the tiny case is
    routed to jax.nn.softmax and only genuinely batched calls use the kernel.
    """
    ops = weights.shape[0]
    return softmax_rows(weights.reshape(1, ops),
                        force_pallas=force_pallas).reshape(ops)


class WeightsPallas:
    """Mirror of the PyTorch `Weights` module's parameter init + forward."""

    def __init__(self, operations: int, batch_size: int = 256):
        # nn.Parameter(torch.ones(operations) * (1 / operations))
        self.weights = jnp.ones((operations,), dtype=jnp.float32) * (1.0 / operations)
        self.batch_size = batch_size
        # TODO(synk): sample()/update() (categorical sampling, log-prob
        # bookkeeping, Adam optimizer step) are host-side training logic and
        # not part of forward(); intentionally not implemented here.

    def forward(self) -> jax.Array:
        return weights_forward(self.weights)


if __name__ == "__main__":
    operations = 8
    key = jax.random.PRNGKey(0)
    k1, k2, k3 = jax.random.split(key, 3)

    # 1) Module forward (single weight vector — matches the PyTorch module).
    #    Tiny shape -> routed to the jax.nn.softmax fast path.
    module = WeightsPallas(operations, batch_size=2)
    out = jax.block_until_ready(module.forward())
    ref = jax.nn.softmax(module.weights, axis=-1)
    assert out.shape == (operations,)
    assert jnp.allclose(out, ref, atol=1e-6), (out, ref)

    # 2) Same forward forced through the Pallas kernel (proves the kernel
    #    compiles and runs on the (1, operations) shape).
    out_p = jax.block_until_ready(weights_forward(module.weights, force_pallas=True))
    assert jnp.allclose(out_p, ref, atol=1e-6), (out_p, ref)

    # 3) Batched Pallas path (small batch of weight rows, single full-extent block).
    xb = jax.random.normal(k1, (2, operations), dtype=jnp.float32)
    outb = jax.block_until_ready(softmax_rows(xb, force_pallas=True))
    refb = jax.nn.softmax(xb, axis=-1)
    assert jnp.allclose(outb, refb, atol=1e-6), (outb, refb)

    # 4) Edge-block path: rows not a multiple of the tile -> partial last block
    #    whose garbage rows must be masked on writeback.
    xe = jax.random.normal(k2, (13, operations), dtype=jnp.float32)
    oute = jax.block_until_ready(softmax_rows(xe, row_tile=8, force_pallas=True))
    refe = jax.nn.softmax(xe, axis=-1)
    assert jnp.allclose(oute, refe, atol=1e-6), (oute, refe)

    # 5) bf16 at the HBM boundary, f32 compute in-kernel.
    xh = jax.random.normal(k3, (16, operations), dtype=jnp.bfloat16)
    outh = jax.block_until_ready(softmax_rows(xh, force_pallas=True))
    refh = jax.nn.softmax(xh.astype(jnp.float32), axis=-1).astype(jnp.bfloat16)
    assert outh.dtype == jnp.bfloat16
    assert jnp.allclose(outh.astype(jnp.float32), refh.astype(jnp.float32),
                        atol=1e-2), (outh, refh)

    print("KERNEL_OK")
</pallas_src>

<mosaic_0001>
module attributes {stable_mosaic.version = 11 : i64} {
  func.func @_softmax_rows_kernel(%arg0: i32, %arg1: memref<1x8xf32, #tpu.memory_space<vmem>>, %arg2: memref<1x8xf32, #tpu.memory_space<vmem>>) attributes {dimension_semantics = [#tpu.dimension_semantics<parallel>], iteration_bounds = array<i64: 1>, scalar_prefetch = 0 : i64, scratch_operands = 0 : i64, tpu.core_type = #tpu.core_type<tc>, window_params = [{transform_indices = @transform_0, window_bounds = array<i64: 1, 8>}, {transform_indices = @transform_1, window_bounds = array<i64: 1, 8>}]} {
    %c0 = arith.constant 0 : index
    %c0_0 = arith.constant 0 : index
    %0 = vector.load %arg1[%c0, %c0_0] : memref<1x8xf32, #tpu.memory_space<vmem>>, vector<1x8xf32>
    %cst = arith.constant dense<0xFF800000> : vector<1xf32>
    %1 = vector.multi_reduction <maximumf>, %0, %cst [1] : vector<1x8xf32> to vector<1xf32>
    %2 = vector.shape_cast %1 : vector<1xf32> to vector<1x1xf32>
    %3 = vector.broadcast %2 : vector<1x1xf32> to vector<1x8xf32>
    %4 = arith.subf %0, %3 : vector<1x8xf32>
    %5 = math.exp %4 : vector<1x8xf32>
    %cst_1 = arith.constant dense<0.000000e+00> : vector<1xf32>
    %6 = vector.multi_reduction <add>, %5, %cst_1 [1] : vector<1x8xf32> to vector<1xf32>
    %7 = vector.shape_cast %6 : vector<1xf32> to vector<1x1xf32>
    %8 = tpu.reciprocal %7 : vector<1x1xf32> -> vector<1x1xf32>
    %9 = vector.broadcast %8 : vector<1x1xf32> to vector<1x8xf32>
    %10 = arith.mulf %5, %9 : vector<1x8xf32>
    %c0_2 = arith.constant 0 : index
    %c0_3 = arith.constant 0 : index
    %11 = vector.load %arg2[%c0_2, %c0_3] : memref<1x8xf32, #tpu.memory_space<vmem>>, vector<1x8xf32>
    tpu.vector_store %arg2[%c0_2, %c0_3], %10 {strides = array<i32>} : memref<1x8xf32, #tpu.memory_space<vmem>>, vector<1x8xf32>,
    return
  }
  func.func @transform_0(%arg0: i32) -> (i32, i32) {
    %c0_i32 = arith.constant 0 : i32
    %c0_i32_0 = arith.constant 0 : i32
    return %arg0, %c0_i32 : i32, i32
  }
  func.func @transform_1(%arg0: i32) -> (i32, i32) {
    %c0_i32 = arith.constant 0 : i32
    %c0_i32_0 = arith.constant 0 : i32
    return %arg0, %c0_i32 : i32, i32
  }
}

</mosaic_0001>

<bundles_post_ra>
// kernel: tpu_custom_call.1
= control target key start
LH: loop header
LB: loop body
LE: loop exit
PB: predicated region body
PF: predicated region fallthrough
CT: control target
= control target key end

     0   :  { %6 = vsyncpa [#allocation3], 0  ;;  %s143_s0 = inlined_call_operand.hbm [shape: f32[1,8], index: 0, kind: input, shape index: {}]   ;;  %s144_s1 = inlined_call_operand.hbm [shape: f32[1,8], index: 1, kind: output, shape index: {}]  }
   0x1   :  { %7 = vsyncpa [#allocation4], 0  ;;  %s104_s6 = smov [#allocation2]   ;;  %s56_s10 = scalar_lea.hbm %s143_s0, 16 }
   0x2   :  { %s14_s7 = sshll.u32 %s104_s6, 4  ;;  %p57_p0 = scmp.ne.s32.totalorder %s143_s0, %s56_s10  ;;  %s15_s7 = int_to_ptr.vmem [resolvable:$true] %s14_s7 }
   0x3   :  { %p60_p1 = scmp.lt.u32.totalorder %s56_s10, %s143_s0 }
   0x5   :  { %p62_p2 = pnand %p60_p1, %p57_p0 }
   0x7   :  { %65 = shalt.err (!%p62_p2)
}
   0x8   :  { %s66_s15 = scalar_lea.vmem %s15_s7, 16  ;;  %s70_s16 = scalar_lea.vmem %s15_s7, 32 }
   0x9   :  { %p67_p3 = scmp.ne.s32.totalorder %s15_s7, %s66_s15  ;;  %p71_p4 = scmp.lt.s32.totalorder %s15_s7, %s15_s7 }
   0xa   :  { %p72_p5 = scmp.lt.s32.totalorder %s70_s16, %s66_s15 }
   0xc   :  { %p73_p6 = por %p72_p5, %p71_p4 }
   0xe   :  { %p74_p7 = pnand %p73_p6, %p67_p3 }
  0x10   :  { %77 = shalt.err (!%p74_p7)
}
  0x11   :  { %17 = dma.hbm_to_vmem [thread:$0]  %s143_s0, 16, %s15_s7, [#allocation3]  }
  0x12   :  { %100 = dma.done.wait [#allocation3], 16  }
  0x13   :  { %101 = vsyncadd [#allocation3], 4294967280  ;;  %vm22_vm0 = vcmask 57344   ;;  %v21_v0 = vld [vmem:[#allocation2] sm:$0x1]  ;;  %s105_s19 = smov [#allocation5]  }
  0x14   :  { %v23_v1 = vsel %vm22_vm0, %v21_v0, -inf  ;;  %s41_s20 = sshll.u32 %s105_s19, 4  ;;  %s42_s20 = int_to_ptr.vmem [resolvable:$true] %s41_s20 }
  0x15   :  { %24 = vmax.xlane.f32.xlu0 %v23_v1  ;;  %s78_s0 = scalar_lea.vmem %s42_s20, 16  ;;  %s82_s21 = scalar_lea.vmem %s42_s20, 32 }
  0x16   :  { %p79_p8 = scmp.ne.s32.totalorder %s42_s20, %s78_s0  ;;  %p83_p9 = scmp.lt.s32.totalorder %s42_s20, %s42_s20 }
  0x17   :  { %p84_p10 = scmp.lt.s32.totalorder %s82_s21, %s78_s0 }
  0x19   :  { %p85_p11 = por %p84_p10, %p83_p9 }
  0x1b   :  { %p86_p12 = pnand %p85_p11, %p79_p8 }
  0xa2   :  { %v25_v2 = vpop.xlane.xlu0 %24 }
  0xa3   :  { %v26_v3 = vsub.f32 %v21_v0, %v25_v2 }
  0xa5   :  { %v27_v4 = vmul.f32 1.442695, %v26_v3 }
  0xa7   :  { %52 = vpow2.f32 %v27_v4 }
  0xb1   :  { %v53_v5 = vpop.eup %52 }
  0xb2   :  { %v29_v6 = vsel %vm22_vm0, %v53_v5, 0.0 }
  0xb3   :  { %30 = vadd.xlane.f32.xlu0 %v29_v6 }
 0x140   :  { %v31_v7 = vpop.xlane.xlu0 %30 }
 0x141   :  { %54 = vrcp.f32 %v31_v7 }
 0x14b   :  { %v55_v8 = vpop.eup %54 }
 0x14c   :  { %v33_v9 = vmul.f32 %v55_v8, %v53_v5 }
 0x14e   :  { %34 = vst.msk [vmem:[#allocation5] sm:$0x1] %vm22_vm0, %v33_v9 }
 0x14f   :  { %89 = shalt.err (!%p86_p12)
}
 0x150   :  { %s90_s24 = scalar_lea.hbm %s144_s1, 16 }
 0x151   :  { %p91_p13 = scmp.ne.s32.totalorder %s144_s1, %s90_s24  ;;  %p94_p0 = scmp.lt.u32.totalorder %s90_s24, %s144_s1 }
 0x153   :  { %p96_p1 = pnand %p94_p0, %p91_p13 }
 0x155   :  { %99 = shalt.err (!%p96_p1)
}
 0x156   :  { %44 = dma.vmem_to_hbm [thread:$0]  %s42_s20, 16, %s144_s1, [#allocation4]  }
 0x157   :  { %102 = dma.done.wait [#allocation4], 16  }
 0x158   :  { %103 = vsyncadd [#allocation4], 4294967280 }
 0x159   :  { %48 = vsyncpa [#allocation3], 1 }
 0x15a   :  { %49 = vsyncpa [#allocation4], 1 }

</bundles_post_ra>
